<compile_context>
chip_gen: v5e
topology: v5e:2x2
jax: 0.10.0
libtpu: 0.0.40
codegen_flags: <defaults>
</compile_context>

<pallas_src>
import functools

import jax
import jax.numpy as jnp
from jax import lax
from jax.experimental import pallas as pl
from jax.experimental.pallas import tpu as pltpu


TILE_B = 16384  # batch tile; ~8 MB/step at D=32,H=64 (fits v5e/v6e/v7x default scoped VMEM)


def _round_up(n, m):
    return ((n + m - 1) // m) * m


def mlp_kernel(x_ref, w1T_ref, b1_ref, w2_ref, b2_ref, o_ref):
    # x_ref:   (tile_b, D) f32   -- natural (B, D) layout, streamed per grid step
    # w1T_ref: (H, D)      f32   -- resident in VMEM (constant index_map)
    # b1_ref:  (H, 1)      f32
    # w2_ref:  (H, 1)      f32
    # b2_ref:  (1, 1)      f32
    # o_ref:   (1, tile_b) f32   -- lane-dense output block (batch on lanes)
    # hT = W1^T @ x^T : contract D of both operands, result (H, tile_b); the operand
    # "transpose" is handled inside the MXU lowering, no wrapper relayout needed.
    hT = lax.dot_general(
        w1T_ref[...], x_ref[...],
        dimension_numbers=(((1,), (1,)), ((), ())),
        preferred_element_type=jnp.float32,
    )
    hT = jnp.maximum(hT + b1_ref[...], 0.0)                    # bias + ReLU, f32
    # Layer 2 as an elementwise-mul + sublane reduction (avoids an M=1 matmul and
    # the bf16 h temporary); per-lane independent, so ragged-tile garbage stays put.
    o = jnp.sum(hT * w2_ref[...], axis=0, keepdims=True)       # (1, tile_b)
    o_ref[...] = o + b2_ref[...]


@functools.partial(jax.jit, static_argnames=("tile_b",))
def net_forward(x, w1, b1, w2, b2, *, tile_b=TILE_B):
    """x: (B, D) f32; w1: (D, H); b1: (H,); w2: (H, 1); b2: (1,). Returns (B,) f32."""
    B, D = x.shape
    H = w1.shape[1]

    tile_b = min(tile_b, _round_up(B, 128))   # lane-aligned tile, never larger than needed
    grid = (pl.cdiv(B, tile_b),)
    Bp = grid[0] * tile_b                     # over-allocate output only (tiny), x is NOT padded

    # Tiny weight reshapes only (H*D elements); x goes straight to the kernel.
    w1T = jnp.transpose(w1).astype(jnp.float32)     # (H, D)
    b1c = b1.reshape(H, 1).astype(jnp.float32)      # (H, 1)
    w2c = w2.reshape(H, 1).astype(jnp.float32)      # (H, 1)
    b2c = b2.reshape(1, 1).astype(jnp.float32)      # (1, 1)

    out = pl.pallas_call(
        mlp_kernel,
        out_shape=jax.ShapeDtypeStruct((1, Bp), jnp.float32),
        grid=grid,
        in_specs=[
            pl.BlockSpec((tile_b, D), lambda i: (i, 0)),   # stream x tiles (ragged last block OK)
            pl.BlockSpec((H, D), lambda i: (0, 0)),        # weights resident across steps
            pl.BlockSpec((H, 1), lambda i: (0, 0)),
            pl.BlockSpec((H, 1), lambda i: (0, 0)),
            pl.BlockSpec((1, 1), lambda i: (0, 0)),
        ],
        out_specs=pl.BlockSpec((1, tile_b), lambda i: (0, i)),  # lane-dense output
        compiler_params=pltpu.CompilerParams(
            dimension_semantics=("parallel",),   # batch tiles shard across v7x's 2 TCs
            vmem_limit_bytes=32 << 20,           # headroom for big tiles; safe on all gens
        ),
    )(x.astype(jnp.float32), w1T, b1c, w2c, b2c)

    return out[0, :B]


def init_params(key, input_dim, hidden=64):
    """Deterministic init mimicking PyTorch nn.Linear default U[-1/sqrt(fan_in), 1/sqrt(fan_in)]."""
    k1, k2, k3, k4 = jax.random.split(key, 4)
    bound1 = 1.0 / jnp.sqrt(jnp.float32(input_dim))
    bound2 = 1.0 / jnp.sqrt(jnp.float32(hidden))
    # Stored as (in, out) so math is x @ W (transpose of torch's (out, in)).
    w1 = jax.random.uniform(k1, (input_dim, hidden), jnp.float32, -bound1, bound1)
    b1 = jax.random.uniform(k2, (hidden,), jnp.float32, -bound1, bound1)
    w2 = jax.random.uniform(k3, (hidden, 1), jnp.float32, -bound2, bound2)
    b2 = jax.random.uniform(k4, (1,), jnp.float32, -bound2, bound2)
    return w1, b1, w2, b2


if __name__ == "__main__":
    key = jax.random.PRNGKey(0)
    k_x, k_p = jax.random.split(key)

    batch, input_dim = 8, 32
    x = jax.random.normal(k_x, (batch, input_dim), jnp.float32)
    w1, b1, w2, b2 = init_params(k_p, input_dim)

    y = net_forward(x, w1, b1, w2, b2)
    y = jax.block_until_ready(y)
    assert y.shape == (batch,), y.shape

    # Pure-f32 reference identical to the PyTorch forward.
    h = jnp.maximum(x @ w1 + b1, 0.0)
    ref = (h @ w2 + b2)[:, 0]
    assert jnp.allclose(y, ref, atol=1e-4, rtol=1e-4), (y, ref)

    print("KERNEL_OK")
</pallas_src>

<mosaic_0001>
module attributes {stable_mosaic.version = 11 : i64} {
  func.func @mlp_kernel(%arg0: i32, %arg1: memref<128x32xf32, #tpu.memory_space<vmem>>, %arg2: memref<64x32xf32, #tpu.memory_space<vmem>>, %arg3: memref<64x1xf32, #tpu.memory_space<vmem>>, %arg4: memref<64x1xf32, #tpu.memory_space<vmem>>, %arg5: memref<1x1xf32, #tpu.memory_space<vmem>>, %arg6: memref<1x128xf32, #tpu.memory_space<vmem>>) attributes {dimension_semantics = [#tpu.dimension_semantics<parallel>], iteration_bounds = array<i64: 1>, scalar_prefetch = 0 : i64, scratch_operands = 0 : i64, tpu.core_type = #tpu.core_type<tc>, window_params = [{transform_indices = @transform_0, window_bounds = array<i64: 128, 32>}, {pipeline_mode = #tpu.pipeline_mode<synchronous>, transform_indices = @transform_1, window_bounds = array<i64: 64, 32>}, {pipeline_mode = #tpu.pipeline_mode<synchronous>, transform_indices = @transform_2, window_bounds = array<i64: 64, 1>}, {pipeline_mode = #tpu.pipeline_mode<synchronous>, transform_indices = @transform_3, window_bounds = array<i64: 64, 1>}, {pipeline_mode = #tpu.pipeline_mode<synchronous>, transform_indices = @transform_4, window_bounds = array<i64: 1, 1>}, {transform_indices = @transform_5, window_bounds = array<i64: 1, 128>}]} {
    %c0 = arith.constant 0 : index
    %c0_0 = arith.constant 0 : index
    %0 = vector.load %arg2[%c0, %c0_0] : memref<64x32xf32, #tpu.memory_space<vmem>>, vector<64x32xf32>
    %c0_1 = arith.constant 0 : index
    %c0_2 = arith.constant 0 : index
    %1 = vector.load %arg1[%c0_1, %c0_2] : memref<128x32xf32, #tpu.memory_space<vmem>>, vector<128x32xf32>
    %cst = arith.constant dense<0.000000e+00> : vector<64x128xf32>
    %2 = tpu.matmul %0, %1, %cst {dimension_numbers = #tpu.dot_dimension_numbers<[1], [1], [0], [0], [0, 0, 1, 0], [], []>} : vector<64x32xf32>, vector<128x32xf32>, vector<64x128xf32> -> vector<64x128xf32>
    %c0_3 = arith.constant 0 : index
    %c0_4 = arith.constant 0 : index
    %3 = vector.load %arg3[%c0_3, %c0_4] : memref<64x1xf32, #tpu.memory_space<vmem>>, vector<64x1xf32>
    %4 = vector.broadcast %3 : vector<64x1xf32> to vector<64x128xf32>
    %5 = arith.addf %2, %4 : vector<64x128xf32>
    %cst_5 = arith.constant 0.000000e+00 : f32
    %6 = vector.broadcast %cst_5 : f32 to vector<64x128xf32>
    %7 = arith.maximumf %5, %6 : vector<64x128xf32>
    %c0_6 = arith.constant 0 : index
    %c0_7 = arith.constant 0 : index
    %8 = vector.load %arg4[%c0_6, %c0_7] : memref<64x1xf32, #tpu.memory_space<vmem>>, vector<64x1xf32>
    %9 = vector.broadcast %8 : vector<64x1xf32> to vector<64x128xf32>
    %10 = arith.mulf %7, %9 : vector<64x128xf32>
    %cst_8 = arith.constant dense<0.000000e+00> : vector<128xf32>
    %11 = vector.multi_reduction <add>, %10, %cst_8 [0] : vector<64x128xf32> to vector<128xf32>
    %12 = vector.shape_cast %11 : vector<128xf32> to vector<1x128xf32>
    %c0_9 = arith.constant 0 : index
    %c0_10 = arith.constant 0 : index
    %13 = vector.load %arg5[%c0_9, %c0_10] : memref<1x1xf32, #tpu.memory_space<vmem>>, vector<1x1xf32>
    %14 = vector.broadcast %13 : vector<1x1xf32> to vector<1x128xf32>
    %15 = arith.addf %12, %14 : vector<1x128xf32>
    %c0_11 = arith.constant 0 : index
    %c0_12 = arith.constant 0 : index
    %16 = vector.load %arg6[%c0_11, %c0_12] : memref<1x128xf32, #tpu.memory_space<vmem>>, vector<1x128xf32>
    tpu.vector_store %arg6[%c0_11, %c0_12], %15 {strides = array<i32>} : memref<1x128xf32, #tpu.memory_space<vmem>>, vector<1x128xf32>,
    return
  }
  func.func @transform_0(%arg0: i32) -> (i32, i32) {
    %c0_i32 = arith.constant 0 : i32
    %c0_i32_0 = arith.constant 0 : i32
    return %arg0, %c0_i32 : i32, i32
  }
  func.func @transform_1(%arg0: i32) -> (i32, i32) {
    %c0_i32 = arith.constant 0 : i32
    %c0_i32_0 = arith.constant 0 : i32
    %c0_i32_1 = arith.constant 0 : i32
    return %c0_i32, %c0_i32_0 : i32, i32
  }
  func.func @transform_2(%arg0: i32) -> (i32, i32) {
    %c0_i32 = arith.constant 0 : i32
    %c0_i32_0 = arith.constant 0 : i32
    %c0_i32_1 = arith.constant 0 : i32
    return %c0_i32, %c0_i32_0 : i32, i32
  }
  func.func @transform_3(%arg0: i32) -> (i32, i32) {
    %c0_i32 = arith.constant 0 : i32
    %c0_i32_0 = arith.constant 0 : i32
    %c0_i32_1 = arith.constant 0 : i32
    return %c0_i32, %c0_i32_0 : i32, i32
  }
  func.func @transform_4(%arg0: i32) -> (i32, i32) {
    %c0_i32 = arith.constant 0 : i32
    %c0_i32_0 = arith.constant 0 : i32
    %c0_i32_1 = arith.constant 0 : i32
    return %c0_i32, %c0_i32_0 : i32, i32
  }
  func.func @transform_5(%arg0: i32) -> (i32, i32) {
    %c0_i32 = arith.constant 0 : i32
    %c0_i32_0 = arith.constant 0 : i32
    return %c0_i32, %arg0 : i32, i32
  }
}

</mosaic_0001>

<bundles_post_ra>
// kernel: net_forward.1
= control target key start
LH: loop header
LB: loop body
LE: loop exit
PB: predicated region body
PF: predicated region fallthrough
CT: control target
= control target key end

     0   :  { %vm94_vm0 = vcmask 261120   ;;  %v374_v1 = vmov 0   ;;  %s603_s0 = inlined_call_operand.vmem [shape: f32[8,32], index: 0, kind: input, shape index: {}]   ;;  %s604_s2 = inlined_call_operand.vmem [shape: f32[64,1], index: 2, kind: input, shape index: {}]   ;;  %s605_s3 = inlined_call_operand.vmem [shape: f32[64,1], index: 3, kind: input, shape index: {}]   ;;  %s606_s4 = inlined_call_operand.<no memory space> [shape: f32[1,1], index: 4, kind: input, shape index: {}]   ;;  %s607_s1 = inlined_call_operand.vmem [shape: f32[64,32], index: 1, kind: input, shape index: {}]   ;;  %s608_s5 = inlined_call_operand.vmem [shape: f32[1,128], index: 5, kind: output, shape index: {}]  }
   0x1   :  { %v45_v0 = vld [vmem:[%s603_s0 + $0x78] sm:$0xff]  ;;  %371 = vset.pattern.permute.xlu0 %v374_v1  ;;  %372 = vset.pattern.permute.xlu1 %v374_v1  ;;  %v46_v2 = vld [vmem:[%s604_s2] sm:$0xff]  ;;  %v44_v3 = vld [vmem:[%s603_s0 + $0x70] sm:$0xff]  ;;  %v10_v15 = vstv %s606_s4 }
   0x2   :  { %298 = vmatpush.xpose.msk.msra.mxu0 %vm94_vm0, %v45_v0  ;;  %322 = vmatpush.xpose.msk.msra.mxu1 %vm94_vm0, %v45_v0  ;;  %v48_v4 = vld [vmem:[%s604_s2 + $0x10] sm:$0xff]  ;;  %v43_v5 = vld [vmem:[%s603_s0 + $0x68] sm:$0xff]  ;;  %v49_v7 = vld [vmem:[%s604_s2 + $0x18] sm:$0xff]  ;;  %11 = vst [vmem:[#allocation2] sm:$0x1] %v10_v15 }
   0x3   :  { %323 = vmatpush.xpose.msk.msra.mxu2 %vm94_vm0, %v45_v0  ;;  %324 = vmatpush.xpose.msk.msra.mxu3 %vm94_vm0, %v45_v0  ;;  %v47_v6 = vld [vmem:[%s604_s2 + $0x8] sm:$0xff]  ;;  %v42_v8 = vld [vmem:[%s603_s0 + $0x60] sm:$0xff]  ;;  %v41_v9 = vld [vmem:[%s603_s0 + $0x58] sm:$0xff] }
   0x4   :  { %56 = vperm.xlu0 %371, %v46_v2   ;;  %66 = vperm.xlu1 %372, %v48_v4   ;;  %v216_v10 = vld [vmem:[%s605_s3] sm:$0xff]  ;;  %v217_v11 = vld [vmem:[%s605_s3 + $0x8] sm:$0xff]  ;;  %v40_v12 = vld [vmem:[%s603_s0 + $0x50] sm:$0xff] }
   0x5   :  { %373 = vset.pattern.permute.xlu2 %v374_v1  ;;  %v39_v13 = vld [vmem:[%s603_s0 + $0x48] sm:$0xff]  ;;  %v50_v14 = vld [vmem:[%s604_s2 + $0x20] sm:$0xff]  ;;  %v219_v16 = vld [vmem:[%s605_s3 + $0x18] sm:$0xff] }
   0x6   :  { %299 = vmatpush.xpose.msk.msra.mxu0 %vm94_vm0, %v44_v3  ;;  %325 = vmatpush.xpose.msk.msra.mxu1 %vm94_vm0, %v44_v3  ;;  %v52_v17 = vld [vmem:[%s604_s2 + $0x30] sm:$0xff]  ;;  %v38_v18 = vld [vmem:[%s603_s0 + $0x40] sm:$0xff]  ;;  %v37_v19 = vld [vmem:[%s603_s0 + $0x38] sm:$0xff] }
   0x7   :  { %326 = vmatpush.xpose.msk.msra.mxu2 %vm94_vm0, %v44_v3  ;;  %327 = vmatpush.xpose.msk.msra.mxu3 %vm94_vm0, %v44_v3  ;;  %v53_v20 = vld [vmem:[%s604_s2 + $0x38] sm:$0xff]  ;;  %v221_v21 = vld [vmem:[%s605_s3 + $0x28] sm:$0xff]  ;;  %v36_v23 = vld [vmem:[%s603_s0 + $0x30] sm:$0xff] }
   0x8   :  { %76 = vperm.xlu2 %373, %v50_v14   ;;  %v51_v22 = vld [vmem:[%s604_s2 + $0x28] sm:$0xff]  ;;  %v223_v25 = vld [vmem:[%s605_s3 + $0x38] sm:$0xff]  ;;  %v218_v27 = vld [vmem:[%s605_s3 + $0x10] sm:$0xff] }
   0x9   :  { %v35_v24 = vld [vmem:[%s603_s0 + $0x28] sm:$0xff]  ;;  %v285_v26 = vld [vmem:[#allocation2] sm:$0x1]  ;;  %v33_v29 = vld [vmem:[%s603_s0 + $0x18] sm:$0xff] }
   0xa   :  { %300 = vmatpush.xpose.msk.msra.mxu0 %vm94_vm0, %v43_v5  ;;  %328 = vmatpush.xpose.msk.msra.mxu1 %vm94_vm0, %v43_v5  ;;  %v34_v28 = vld [vmem:[%s603_s0 + $0x20] sm:$0xff]  ;;  %v32_v31 = vld [vmem:[%s603_s0 + $0x10] sm:$0xff]  ;;  %v31_v32 = vld [vmem:[%s603_s0 + $0x8] sm:$0xff] }
   0xb   :  { %329 = vmatpush.xpose.msk.msra.mxu2 %vm94_vm0, %v43_v5  ;;  %330 = vmatpush.xpose.msk.msra.mxu3 %vm94_vm0, %v43_v5  ;;  %v220_v30 = vld [vmem:[%s605_s3 + $0x20] sm:$0xff]  ;;  %v222_v33 = vld [vmem:[%s605_s3 + $0x30] sm:$0xff]  ;;  %v23_v39 = vld [vmem:[%s607_s1 + $0x8] sm:$0xff] }
   0xc   :  { %61 = vperm.xlu0 %371, %v47_v6   ;;  %71 = vperm.xlu1 %372, %v49_v7   ;;  %v30_v34 = vld [vmem:[%s603_s0] sm:$0xff]  ;;  %v24_v36 = vld [vmem:[%s607_s1 + $0x10] sm:$0xff]  ;;  %v25_v40 = vld [vmem:[%s607_s1 + $0x18] sm:$0xff] }
   0xd   :  { %v22_v35 = vld [vmem:[%s607_s1] sm:$0xff]  ;;  %v28_v38 = vld [vmem:[%s607_s1 + $0x30] sm:$0xff]  ;;  %v27_v41 = vld [vmem:[%s607_s1 + $0x28] sm:$0xff] }
   0xe   :  { %301 = vmatpush.xpose.msk.msra.mxu0 %vm94_vm0, %v42_v8  ;;  %331 = vmatpush.xpose.msk.msra.mxu1 %vm94_vm0, %v42_v8  ;;  %v26_v37 = vld [vmem:[%s607_s1 + $0x20] sm:$0xff]  ;;  %v29_v42 = vld [vmem:[%s607_s1 + $0x38] sm:$0xff] }
   0xf   :  { %332 = vmatpush.xpose.msk.msra.mxu2 %vm94_vm0, %v42_v8  ;;  %333 = vmatpush.xpose.msk.msra.mxu3 %vm94_vm0, %v42_v8 }
  0x10   :  { %81 = vperm.xlu2 %373, %v51_v22  }
  0x12   :  { %302 = vmatpush.xpose.msk.msra.mxu0 %vm94_vm0, %v41_v9  ;;  %334 = vmatpush.xpose.msk.msra.mxu1 %vm94_vm0, %v41_v9 }
  0x13   :  { %335 = vmatpush.xpose.msk.msra.mxu2 %vm94_vm0, %v41_v9  ;;  %336 = vmatpush.xpose.msk.msra.mxu3 %vm94_vm0, %v41_v9 }
  0x14   :  { %226 = vperm.xlu0 %371, %v216_v10   ;;  %231 = vperm.xlu1 %372, %v217_v11  }
  0x16   :  { %303 = vmatpush.xpose.msk.msra.mxu0 %vm94_vm0, %v40_v12  ;;  %337 = vmatpush.xpose.msk.msra.mxu1 %vm94_vm0, %v40_v12 }
  0x17   :  { %338 = vmatpush.xpose.msk.msra.mxu2 %vm94_vm0, %v40_v12  ;;  %339 = vmatpush.xpose.msk.msra.mxu3 %vm94_vm0, %v40_v12 }
  0x18   :  { %236 = vperm.xlu2 %373, %v218_v27  }
  0x1a   :  { %304 = vmatpush.xpose.msk.msra.mxu0 %vm94_vm0, %v39_v13  ;;  %340 = vmatpush.xpose.msk.msra.mxu1 %vm94_vm0, %v39_v13 }
  0x1b   :  { %341 = vmatpush.xpose.msk.msra.mxu2 %vm94_vm0, %v39_v13  ;;  %342 = vmatpush.xpose.msk.msra.mxu3 %vm94_vm0, %v39_v13 }
  0x1c   :  { %241 = vperm.xlu0 %371, %v219_v16   ;;  %86 = vperm.xlu1 %372, %v52_v17  }
  0x1e   :  { %305 = vmatpush.xpose.msk.msra.mxu0 %vm94_vm0, %v38_v18  ;;  %343 = vmatpush.xpose.msk.msra.mxu1 %vm94_vm0, %v38_v18 }
  0x1f   :  { %344 = vmatpush.xpose.msk.msra.mxu2 %vm94_vm0, %v38_v18  ;;  %345 = vmatpush.xpose.msk.msra.mxu3 %vm94_vm0, %v38_v18 }
  0x20   :  { %246 = vperm.xlu2 %373, %v220_v30  }
  0x22   :  { %306 = vmatpush.xpose.msk.msra.mxu0 %vm94_vm0, %v37_v19  ;;  %346 = vmatpush.xpose.msk.msra.mxu1 %vm94_vm0, %v37_v19 }
  0x23   :  { %347 = vmatpush.xpose.msk.msra.mxu2 %vm94_vm0, %v37_v19  ;;  %348 = vmatpush.xpose.msk.msra.mxu3 %vm94_vm0, %v37_v19 }
  0x24   :  { %91 = vperm.xlu0 %371, %v53_v20   ;;  %251 = vperm.xlu1 %372, %v221_v21  }
  0x26   :  { %307 = vmatpush.xpose.msk.msra.mxu0 %vm94_vm0, %v36_v23  ;;  %349 = vmatpush.xpose.msk.msra.mxu1 %vm94_vm0, %v36_v23 }
  0x27   :  { %350 = vmatpush.xpose.msk.msra.mxu2 %vm94_vm0, %v36_v23  ;;  %351 = vmatpush.xpose.msk.msra.mxu3 %vm94_vm0, %v36_v23 }
  0x28   :  { %256 = vperm.xlu2 %373, %v222_v33  }
  0x2a   :  { %308 = vmatpush.xpose.msk.msra.mxu0 %vm94_vm0, %v35_v24  ;;  %352 = vmatpush.xpose.msk.msra.mxu1 %vm94_vm0, %v35_v24 }
  0x2b   :  { %353 = vmatpush.xpose.msk.msra.mxu2 %vm94_vm0, %v35_v24  ;;  %354 = vmatpush.xpose.msk.msra.mxu3 %vm94_vm0, %v35_v24 }
  0x2c   :  { %261 = vperm.xlu0 %371, %v223_v25   ;;  %288 = vperm.xlu1 %372, %v285_v26  }
  0x2e   :  { %309 = vmatpush.xpose.msk.msra.mxu0 %vm94_vm0, %v34_v28  ;;  %355 = vmatpush.xpose.msk.msra.mxu1 %vm94_vm0, %v34_v28 }
  0x2f   :  { %356 = vmatpush.xpose.msk.msra.mxu2 %vm94_vm0, %v34_v28  ;;  %357 = vmatpush.xpose.msk.msra.mxu3 %vm94_vm0, %v34_v28 }
  0x32   :  { %310 = vmatpush.xpose.msk.msra.mxu0 %vm94_vm0, %v33_v29  ;;  %358 = vmatpush.xpose.msk.msra.mxu1 %vm94_vm0, %v33_v29 }
  0x33   :  { %359 = vmatpush.xpose.msk.msra.mxu2 %vm94_vm0, %v33_v29  ;;  %360 = vmatpush.xpose.msk.msra.mxu3 %vm94_vm0, %v33_v29 }
  0x36   :  { %311 = vmatpush.xpose.msk.msra.mxu0 %vm94_vm0, %v32_v31  ;;  %361 = vmatpush.xpose.msk.msra.mxu1 %vm94_vm0, %v32_v31 }
  0x37   :  { %362 = vmatpush.xpose.msk.msra.mxu2 %vm94_vm0, %v32_v31  ;;  %363 = vmatpush.xpose.msk.msra.mxu3 %vm94_vm0, %v32_v31 }
  0x3a   :  { %312 = vmatpush.xpose.msk.msra.mxu0 %vm94_vm0, %v31_v32  ;;  %364 = vmatpush.xpose.msk.msra.mxu1 %vm94_vm0, %v31_v32 }
  0x3b   :  { %365 = vmatpush.xpose.msk.msra.mxu2 %vm94_vm0, %v31_v32  ;;  %366 = vmatpush.xpose.msk.msra.mxu3 %vm94_vm0, %v31_v32 }
  0x3e   :  { %313 = vmatpush.xpose.msk.msra.mxu0 %vm94_vm0, %v30_v34  ;;  %367 = vmatpush.xpose.msk.msra.mxu1 %vm94_vm0, %v30_v34 }
  0x3f   :  { %368 = vmatpush.xpose.msk.msra.mxu2 %vm94_vm0, %v30_v34  ;;  %369 = vmatpush.xpose.msk.msra.mxu3 %vm94_vm0, %v30_v34 }
  0x41   :  { %314 = vmatmul.msk.f32.vlgmr.msra.gmra.mxu0 %vm94_vm0, %v22_v35  ;;  %316 = vmatmul.msk.f32.vlgmr.msra.gmra.mxu1 %vm94_vm0, %v24_v36 }
  0x42   :  { %318 = vmatmul.msk.f32.vlgmr.msra.gmra.mxu2 %vm94_vm0, %v26_v37  ;;  %320 = vmatmul.msk.f32.vlgmr.msra.gmra.mxu3 %vm94_vm0, %v28_v38 }
  0x49   :  { %315 = vmatmul.msk.f32.gmra.mxu0 %vm94_vm0, %v23_v39  ;;  %317 = vmatmul.msk.f32.gmra.mxu1 %vm94_vm0, %v25_v40 }
  0x4a   :  { %319 = vmatmul.msk.f32.gmra.mxu2 %vm94_vm0, %v27_v41  ;;  %321 = vmatmul.msk.f32.gmra.mxu3 %vm94_vm0, %v29_v42 }
  0x62   :  { %v77_v45 = vpop.permute.xlu2 %76 }
  0x6a   :  { %v82_v48 = vpop.permute.xlu2 %81 }
  0x72   :  { %v237_v53 = vpop.permute.xlu2 %236 }
  0x76   :  { %v57_v43 = vpop.permute.xlu0 %56  ;;  %v67_v44 = vpop.permute.xlu1 %66 }
  0x7a   :  { %v247_v4 = vpop.permute.xlu2 %246 }
  0x7e   :  { %v62_v46 = vpop.permute.xlu0 %61  ;;  %v72_v47 = vpop.permute.xlu1 %71 }
  0x82   :  { %v257_v27 = vpop.permute.xlu2 %256 }
  0x86   :  { %v227_v49 = vpop.permute.xlu0 %226  ;;  %v232_v50 = vpop.permute.xlu1 %231 }
  0x8e   :  { %v242_v54 = vpop.permute.xlu0 %241  ;;  %v87_v0 = vpop.permute.xlu1 %86 }
  0x96   :  { %v92_v8 = vpop.permute.xlu0 %91  ;;  %v252_v23 = vpop.permute.xlu1 %251 }
  0x9e   :  { %v262_v30 = vpop.permute.xlu0 %261  ;;  %v289_v38 = vpop.permute.xlu1 %288 }
  0x9f   :  { %v291_v40 = vperm.slane %v289_v38, 0 }
  0xbe   :  { %v184_v51 = vpop.f32.mrf.mxu0  ;;  %v190_v52 = vpop.f32.mrf.mxu1 }
  0xbf   :  { %v185_v55 = vadd.f32 %v184_v51, %v57_v43  ;;  %v191_v56 = vadd.f32 %v190_v52, %v67_v44 }
  0xc1   :  { %v208_v61 = vmax.f32 %v185_v55, 0.0  ;;  %v210_v1 = vmax.f32 %v191_v56, 0.0 }
  0xc3   :  { %v264_v5 = vmul.f32 %v227_v49, %v208_v61  ;;  %v266_v9 = vmul.f32 %v237_v53, %v210_v1 }
  0xc5   :  { %v196_v57 = vpop.f32.mrf.mxu2  ;;  %v202_v58 = vpop.f32.mrf.mxu3 }
  0xc6   :  { %v187_v59 = vpop.f32.mrf.mxu0  ;;  %v193_v60 = vpop.f32.mrf.mxu1  ;;  %v197_v2 = vadd.f32 %v196_v57, %v77_v45  ;;  %v203_v11 = vadd.f32 %v202_v58, %v87_v0 }
  0xc7   :  { %v188_v62 = vadd.f32 %v187_v59, %v62_v46  ;;  %v194_v63 = vadd.f32 %v193_v60, %v72_v47 }
  0xc8   :  { %v212_v10 = vmax.f32 %v197_v2, 0.0  ;;  %v214_v21 = vmax.f32 %v203_v11, 0.0 }
  0xc9   :  { %v209_v3 = vmax.f32 %v188_v62, 0.0  ;;  %v211_v7 = vmax.f32 %v194_v63, 0.0 }
  0xca   :  { %v268_v20 = vmul.f32 %v247_v4, %v212_v10  ;;  %v270_v28 = vmul.f32 %v257_v27, %v214_v21 }
  0xcb   :  { %v265_v6 = vmul.f32 %v232_v50, %v209_v3  ;;  %v267_v16 = vmul.f32 %v242_v54, %v211_v7 }
  0xcd   :  { %v272_v12 = vadd.f32 %v265_v6, %v264_v5  ;;  %v199_v13 = vpop.f32.mrf.mxu2  ;;  %v205_v14 = vpop.f32.mrf.mxu3 }
  0xce   :  { %v200_v15 = vadd.f32 %v199_v13, %v82_v48  ;;  %v206_v18 = vadd.f32 %v205_v14, %v92_v8 }
  0xcf   :  { %v273_v17 = vadd.f32 %v272_v12, %v266_v9 }
  0xd0   :  { %v213_v19 = vmax.f32 %v200_v15, 0.0  ;;  %v215_v26 = vmax.f32 %v206_v18, 0.0 }
  0xd1   :  { %v274_v22 = vadd.f32 %v273_v17, %v267_v16 }
  0xd2   :  { %v269_v24 = vmul.f32 %v252_v23, %v213_v19  ;;  %v271_v31 = vmul.f32 %v262_v30, %v215_v26 }
  0xd3   :  { %v275_v25 = vadd.f32 %v274_v22, %v268_v20 }
  0xd5   :  { %v276_v29 = vadd.f32 %v275_v25, %v269_v24 }
  0xd7   :  { %v277_v32 = vadd.f32 %v276_v29, %v270_v28 }
  0xd9   :  { %v278_v33 = vadd.f32 %v277_v32, %v271_v31 }
  0xdb   :  { %v279_v34 = vrot.slane %v278_v33, 4 }
  0xdd   :  { %v280_v35 = vadd.f32 %v279_v34, %v278_v33 }
  0xdf   :  { %v281_v36 = vrot.slane %v280_v35, 2 }
  0xe1   :  { %v282_v37 = vadd.f32 %v281_v36, %v280_v35 }
  0xe3   :  { %v283_v39 = vrot.slane %v282_v37, 1 }
  0xe5   :  { %v284_v41 = vadd.f32 %v283_v39, %v282_v37 }
  0xe7   :  { %v292_v42 = vadd.f32 %v291_v40, %v284_v41 }
  0xe9   :  { %293 = vst [vmem:[%s608_s5] sm:$0x1] %v292_v42 }

</bundles_post_ra>
